<compile_context>
chip_gen: v6e
topology: v6e:2x2x1
jax: 0.10.0
libtpu: 0.0.40
codegen_flags: <defaults>
</compile_context>

<pallas_src>
import functools
import math

import jax
import jax.numpy as jnp
from jax import lax
from jax.experimental import pallas as pl
from jax.experimental.pallas import tpu as pltpu


# ----------------------------- tiling helpers --------------------------------

def _pick_tile(dim, target, align):
    """Largest divisor of `dim` that is <= target and a multiple of `align`.
    Falls back to the full extent (always layout-legal).
    # TODO(synk): pad/mask ragged dims instead of falling back to full extent."""
    if dim <= target:
        return dim
    t = (target // align) * align
    while t >= align:
        if dim % t == 0:
            return t
        t -= align
    return dim


def _interleave_groups(raw, rot, tn):
    """Interleave column groups of width tn: output columns
    [g*2tn : g*2tn+tn] = raw[:, g*tn:(g+1)*tn], next tn columns = rot group g.
    Keeps the XPos epilogue tile-local under N-tiling."""
    lead = raw.shape[:-1]
    n = raw.shape[-1]
    g = n // tn
    a = raw.reshape(lead + (g, tn))
    b = rot.reshape(lead + (g, tn))
    return jnp.concatenate([a, b], axis=-1).reshape(lead + (2 * n,))


# ---------------------- fused q/k projection + XPos kernel -------------------

def _qk_xpos_kernel(x_ref, w_ref, b_ref, cos_ref, sin_ref, o_ref, acc_ref, *, tn):
    kb = pl.program_id(4)

    @pl.when(kb == 0)
    def _():
        acc_ref[...] = jnp.zeros_like(acc_ref)

    # (tl, tk) @ (tk, 2*tn), accumulated in f32 over the K grid axis.
    acc_ref[...] += jnp.dot(x_ref[0], w_ref[0], preferred_element_type=jnp.float32)

    @pl.when(kb == pl.num_programs(4) - 1)
    def _():
        full = acc_ref[...] + b_ref[0].astype(jnp.float32)   # (tl, 2*tn)
        raw = full[:, :tn]                                    # x @ W        (tile)
        rot = full[:, tn:]                                    # x @ (W @ R)  (tile)
        # XPos: x*cos + rotate_every_two(x)*sin  (1/sqrt(D) folded into q tables)
        o_ref[0, 0] = (raw * cos_ref[0] + rot * sin_ref[0]).astype(o_ref.dtype)


def pallas_qk_xpos(x, w_stack, b_stack, cos_stack, sin_stack, *, tn):
    B, L, E = x.shape
    tl = _pick_tile(L, 256, 8)
    tk = _pick_tile(E, 512, 128)
    grid = (B, L // tl, 2, E // tn, E // tk)

    kernel = functools.partial(_qk_xpos_kernel, tn=tn)
    return pl.pallas_call(
        kernel,
        out_shape=jax.ShapeDtypeStruct((2, B, L, E), x.dtype),
        grid_spec=pltpu.PrefetchScalarGridSpec(
            num_scalar_prefetch=0,
            grid=grid,
            in_specs=[
                pl.BlockSpec((1, tl, tk), lambda b, lt, s, nt, kb: (b, lt, kb)),
                pl.BlockSpec((1, tk, 2 * tn), lambda b, lt, s, nt, kb: (s, kb, nt)),
                pl.BlockSpec((1, 1, 2 * tn), lambda b, lt, s, nt, kb: (s, 0, nt)),
                pl.BlockSpec((1, tl, tn), lambda b, lt, s, nt, kb: (s, lt, nt)),
                pl.BlockSpec((1, tl, tn), lambda b, lt, s, nt, kb: (s, lt, nt)),
            ],
            out_specs=pl.BlockSpec((1, 1, tl, tn),
                                   lambda b, lt, s, nt, kb: (s, b, lt, nt)),
            scratch_shapes=[pltpu.VMEM((tl, 2 * tn), jnp.float32)],
        ),
        compiler_params=pltpu.CompilerParams(
            dimension_semantics=("parallel", "parallel", "parallel", "parallel",
                                 "arbitrary"),
            vmem_limit_bytes=64 * 1024 * 1024),
    )(x, w_stack, b_stack, cos_stack, sin_stack)


# ---------------------------- flash attention kernel -------------------------

def _flash_attn_kernel(q_ref, k_ref, v_ref, o_ref, m_sc, l_sc, acc_sc, *,
                       heads_per_group, head_dim):
    kv = pl.program_id(3)

    @pl.when(kv == 0)
    def _():
        m_sc[...] = jnp.full(m_sc.shape, -jnp.inf, m_sc.dtype)
        l_sc[...] = jnp.zeros(l_sc.shape, l_sc.dtype)
        acc_sc[...] = jnp.zeros(acc_sc.shape, acc_sc.dtype)

    q_all = q_ref[0, 0]     # (tq,  hg*D) — native dtype straight into the MXU
    k_all = k_ref[0, 0]     # (tkv, hg*D)
    v_all = v_ref[0]        # (tkv, hg*D)

    for h in range(heads_per_group):   # tiny static loop (hg <= 2 when D >= 64)
        sl = slice(h * head_dim, (h + 1) * head_dim)
        # q . k^T without an explicit transpose (contract last dims).
        s = lax.dot_general(q_all[:, sl], k_all[:, sl], (((1,), (1,)), ((), ())),
                            preferred_element_type=jnp.float32)      # (tq, tkv)
        # TODO(synk): attn_mask / key_padding_mask additions not implemented.
        m_prev = m_sc[h]
        m_new = jnp.maximum(m_prev, jnp.max(s, axis=-1, keepdims=True))
        alpha = jnp.exp(m_prev - m_new)
        p = jnp.exp(s - m_new)
        l_sc[h] = alpha * l_sc[h] + jnp.sum(p, axis=-1, keepdims=True)
        # TODO(synk): training-mode dropout on attn_probs omitted (eval identity).
        acc_sc[h] = alpha * acc_sc[h] + jnp.dot(p.astype(v_all.dtype), v_all[:, sl],
                                                preferred_element_type=jnp.float32)
        m_sc[h] = m_new

    @pl.when(kv == pl.num_programs(3) - 1)
    def _():
        # Normalize AFTER the PV matmul (L*D work, not L*L); EUP reciprocal.
        parts = [acc_sc[h] * pl.reciprocal(l_sc[h], approx=True)
                 for h in range(heads_per_group)]
        out = parts[0] if heads_per_group == 1 else jnp.concatenate(parts, axis=-1)
        o_ref[0] = out.astype(o_ref.dtype)   # single lane-dense store per q tile


def pallas_flash_attention(qk_stacked, v, *, num_heads, head_dim):
    _, B, L, E = qk_stacked.shape
    D = head_dim
    if D % 128 == 0:
        hg = 1                                   # one head per grid step
    elif 128 % D == 0 and num_heads % (128 // D) == 0:
        hg = 128 // D                            # pack heads to a 128-lane group
    else:
        hg = num_heads                           # tiny models: full-E group
    gw = hg * D
    tq = _pick_tile(L, 256, 8)
    tkv = _pick_tile(L, 512, 8)
    grid = (B, num_heads // hg, L // tq, L // tkv)

    q_spec = pl.BlockSpec((1, 1, tq, gw), lambda b, g, qi, ki: (0, b, qi, g))
    k_spec = pl.BlockSpec((1, 1, tkv, gw), lambda b, g, qi, ki: (1, b, ki, g))
    v_spec = pl.BlockSpec((1, tkv, gw), lambda b, g, qi, ki: (b, ki, g))
    o_spec = pl.BlockSpec((1, tq, gw), lambda b, g, qi, ki: (b, qi, g))

    kernel = functools.partial(_flash_attn_kernel, heads_per_group=hg, head_dim=D)
    return pl.pallas_call(
        kernel,
        out_shape=jax.ShapeDtypeStruct((B, L, E), v.dtype),
        grid_spec=pltpu.PrefetchScalarGridSpec(
            num_scalar_prefetch=0,
            grid=grid,
            in_specs=[q_spec, k_spec, v_spec],
            out_specs=o_spec,
            scratch_shapes=[
                pltpu.VMEM((hg, tq, 1), jnp.float32),   # running row max
                pltpu.VMEM((hg, tq, 1), jnp.float32),   # running denominator
                pltpu.VMEM((hg, tq, D), jnp.float32),   # un-normalized PV acc
            ]),
        compiler_params=pltpu.CompilerParams(
            dimension_semantics=("parallel", "parallel", "parallel", "arbitrary"),
            vmem_limit_bytes=64 * 1024 * 1024),
    )(qk_stacked, qk_stacked, v)


# ------------------------------ tiled linear ----------------------------------

def _linear_kernel(x_ref, w_ref, b_ref, o_ref, acc_ref):
    kb = pl.program_id(2)

    @pl.when(kb == 0)
    def _():
        acc_ref[...] = jnp.zeros_like(acc_ref)

    acc_ref[...] += jnp.dot(x_ref[...], w_ref[...],
                            preferred_element_type=jnp.float32)

    @pl.when(kb == pl.num_programs(2) - 1)
    def _():
        o_ref[...] = (acc_ref[...] + b_ref[...].astype(jnp.float32)).astype(o_ref.dtype)


def pallas_linear(x, w_t, b):
    M, K = x.shape
    N = w_t.shape[1]
    tm = _pick_tile(M, 1024, 8)      # large M tile => weight re-streamed fewer times
    tn = _pick_tile(N, 512, 128)
    tk = _pick_tile(K, 512, 128)
    grid = (M // tm, N // tn, K // tk)
    return pl.pallas_call(
        _linear_kernel,
        out_shape=jax.ShapeDtypeStruct((M, N), x.dtype),
        grid_spec=pltpu.PrefetchScalarGridSpec(
            num_scalar_prefetch=0,
            grid=grid,
            in_specs=[
                pl.BlockSpec((tm, tk), lambda m, n, kb: (m, kb)),
                pl.BlockSpec((tk, tn), lambda m, n, kb: (kb, n)),
                pl.BlockSpec((1, tn), lambda m, n, kb: (0, n)),
            ],
            out_specs=pl.BlockSpec((tm, tn), lambda m, n, kb: (m, n)),
            scratch_shapes=[pltpu.VMEM((tm, tn), jnp.float32)],
        ),
        compiler_params=pltpu.CompilerParams(
            dimension_semantics=("parallel", "parallel", "arbitrary"),
            vmem_limit_bytes=64 * 1024 * 1024),
    )(x, w_t, b.reshape(1, N))


# ----------------------------- XPos tables (glue) -----------------------------

def _xpos_tables(head_dim, scale_base, length, offset, downscale):
    """Torchscale-style XPOS tables: (cos*scale, sin*scale), each
    duplicate-interleaved to shape (length, head_dim)."""
    half = head_dim // 2
    scale_vec = (jnp.arange(0, head_dim, 2, dtype=jnp.float32) + 0.4 * head_dim) / (1.4 * head_dim)
    min_pos = -(length + offset) // 2
    max_pos = length + offset + min_pos
    power = jnp.arange(min_pos, max_pos, dtype=jnp.float32) / float(scale_base)
    scale = scale_vec[None, :] ** power[:, None]

    seq_len = scale.shape[0]
    inv_freq = 1.0 / (10000.0 ** (jnp.arange(0, half, dtype=jnp.float32) / half))
    sinusoid = jnp.arange(seq_len, dtype=jnp.float32)[:, None] * inv_freq[None, :]
    sin, cos = jnp.sin(sinusoid), jnp.cos(sinusoid)

    if seq_len > length:
        scale, sin, cos = scale[-length:], sin[-length:], cos[-length:]
    if downscale:
        scale = 1.0 / scale

    cos_s = jnp.repeat(cos * scale, 2, axis=-1)   # duplicate_interleave
    sin_s = jnp.repeat(sin * scale, 2, axis=-1)
    return cos_s, sin_s


def _rotate_every_two_matrix(d, dtype):
    # z = x @ M with z[2i] = -x[2i+1], z[2i+1] = x[2i]   (entries 0 / +-1, exact)
    m = jnp.zeros((d, d), dtype)
    idx = jnp.arange(0, d, 2)
    m = m.at[idx + 1, idx].set(-1.0)
    m = m.at[idx, idx + 1].set(1.0)
    return m


# ------------------------ one-time parameter preparation ----------------------

def prepare_params(params, *, num_heads, seq_len, xpos_scale_base=512, offset=0):
    """Hoisted host-side construction of fused weights / biases / XPos tables
    (done once, NOT per forward call)."""
    E = params["wq"].shape[0]
    H = num_heads
    D = E // H
    L = seq_len
    scaling = float(D) ** (-0.5)

    tn = _pick_tile(E, 256, 128)      # output-column tile of the q/k projection

    rot = _rotate_every_two_matrix(D, jnp.float32)
    R = jnp.kron(jnp.eye(H, dtype=jnp.float32), rot)          # (E, E), per-head blocks

    def fuse(w, b):
        wt = w.T.astype(jnp.float32)
        wf = _interleave_groups(wt, wt @ R, tn)                # (E, 2E)
        bf = _interleave_groups(b, b @ R, tn)                  # (2E,)
        return wf, bf

    wq_f, bq_f = fuse(params["wq"], params["bq"])
    wk_f, bk_f = fuse(params["wk"], params["bk"])
    w_stack = jnp.stack([wq_f, wk_f])                          # (2, E, 2E)
    b_stack = jnp.stack([bq_f, bk_f]).reshape(2, 1, 2 * E)     # (2, 1, 2E)

    kcos, ksin = _xpos_tables(D, xpos_scale_base, L, offset=0, downscale=True)
    qcos, qsin = _xpos_tables(D, xpos_scale_base, L, offset=offset, downscale=False)
    # Per-head (L, D) tables tiled across heads (lane-dense); 1/sqrt(D) folded
    # into the q tables.  Streamed in (tl, tn) tiles by the projection kernel.
    cos_stack = jnp.stack([jnp.tile(qcos * scaling, (1, H)), jnp.tile(kcos, (1, H))])
    sin_stack = jnp.stack([jnp.tile(qsin * scaling, (1, H)), jnp.tile(ksin, (1, H))])

    return {
        "w_stack": w_stack, "b_stack": b_stack,
        "cos_stack": cos_stack, "sin_stack": sin_stack,
        "wv_t": params["wv"].T, "bv": params["bv"],
        "wo_t": params["wo"].T, "bo": params["bo"],
        "tn": tn,
    }


# ----------------------------- Forward wrapper --------------------------------

def berp_xpos_mha_forward(query, key, value, prepared, *, num_heads):
    # self_attention=True path (the only one with XPos); q/k come from the same
    # input so the projections share one fused kernel.
    # TODO(synk): cross-attention (key/value != query) path is not fused here.
    del key, value
    B, L, E = query.shape
    H = num_heads
    D = E // H

    qk = pallas_qk_xpos(query, prepared["w_stack"], prepared["b_stack"],
                        prepared["cos_stack"], prepared["sin_stack"],
                        tn=prepared["tn"])                          # (2, B, L, E)
    v = pallas_linear(query.reshape(B * L, E), prepared["wv_t"],
                      prepared["bv"]).reshape(B, L, E)
    attn = pallas_flash_attention(qk, v, num_heads=H, head_dim=D)   # (B, L, E)

    # subln=False -> no inner LayerNorm.
    out = pallas_linear(attn.reshape(B * L, E), prepared["wo_t"], prepared["bo"])
    return out.reshape(B, L, E)


# ----------------------------- Pure-JAX reference -----------------------------

def _reference_forward(query, key, value, params, *, num_heads,
                       xpos_scale_base=512, offset=0):
    B, L, E = query.shape
    H = num_heads
    D = E // H

    def lin(x, w, b):
        return x @ w.T + b

    def split(x):
        return x.reshape(B, L, H, D).transpose(0, 2, 1, 3).reshape(B * H, L, D)

    def rot(x):
        x1, x2 = x[..., 0::2], x[..., 1::2]
        return jnp.stack((-x2, x1), axis=-1).reshape(x.shape)

    q = split(lin(query, params["wq"], params["bq"]))
    k = split(lin(key, params["wk"], params["bk"]))
    v = split(lin(value, params["wv"], params["bv"]))

    kcos, ksin = _xpos_tables(D, xpos_scale_base, L, offset=0, downscale=True)
    qcos, qsin = _xpos_tables(D, xpos_scale_base, L, offset=offset, downscale=False)
    q = q * qcos + rot(q) * qsin
    k = k * kcos + rot(k) * ksin

    q = q * (float(D) ** (-0.5))
    s = jnp.einsum("bld,bmd->blm", q, k)
    p = jax.nn.softmax(s, axis=-1)
    a = jnp.einsum("blm,bmd->bld", p, v)
    a = a.reshape(B, H, L, D).transpose(0, 2, 1, 3).reshape(B, L, E)
    return lin(a, params["wo"], params["bo"])


# ----------------------------------- Main --------------------------------------

if __name__ == "__main__":
    B, L, E, H = 2, 8, 32, 4          # embed_dim=32, num_heads=4, head_dim=8
    SCALE_BASE = 512

    root = jax.random.PRNGKey(0)
    k_q, k_k, k_v, k_o, k_bq, k_bk, k_bv, k_bo, k_x = jax.random.split(root, 9)

    def xavier_uniform(key, shape, gain):
        fan_out, fan_in = shape
        bound = gain * math.sqrt(6.0 / (fan_in + fan_out))
        return jax.random.uniform(key, shape, jnp.float32, -bound, bound)

    g = 1.0 / math.sqrt(2.0)
    params = {
        "wq": xavier_uniform(k_q, (E, E), g),
        "wk": xavier_uniform(k_k, (E, E), g),
        "wv": xavier_uniform(k_v, (E, E), g),
        "wo": xavier_uniform(k_o, (E, E), 1.0),
        "bq": jax.random.uniform(k_bq, (E,), jnp.float32, -0.1, 0.1),
        "bk": jax.random.uniform(k_bk, (E,), jnp.float32, -0.1, 0.1),
        "bv": jax.random.uniform(k_bv, (E,), jnp.float32, -0.1, 0.1),
        "bo": jnp.zeros((E,), jnp.float32),
    }

    query = jax.random.normal(k_x, (B, L, E), jnp.float32)
    key_in = query      # self_attention=True
    value = query

    # One-time fused-parameter construction (hoisted out of the forward).
    prepared = prepare_params(params, num_heads=H, seq_len=L,
                              xpos_scale_base=SCALE_BASE, offset=0)
    prepared = jax.tree_util.tree_map(
        lambda x: jax.block_until_ready(x) if isinstance(x, jax.Array) else x, prepared)

    out = berp_xpos_mha_forward(query, key_in, value, prepared, num_heads=H)
    out = jax.block_until_ready(out)

    ref = _reference_forward(query, key_in, value, params,
                             num_heads=H, xpos_scale_base=SCALE_BASE, offset=0)
    ref = jax.block_until_ready(ref)

    assert out.shape == (B, L, E)
    assert jnp.allclose(out, ref, atol=2e-2, rtol=2e-2), (
        f"max abs diff {float(jnp.max(jnp.abs(out - ref)))}")

    print("KERNEL_OK")
</pallas_src>

<mosaic_0001>
module attributes {stable_mosaic.version = 11 : i64} {
  func.func @_qk_xpos_kernel(%arg0: i32, %arg1: i32, %arg2: i32, %arg3: i32, %arg4: i32, %arg5: memref<1x8x32xf32, #tpu.memory_space<vmem>>, %arg6: memref<1x32x64xf32, #tpu.memory_space<vmem>>, %arg7: memref<1x1x64xf32, #tpu.memory_space<vmem>>, %arg8: memref<1x8x32xf32, #tpu.memory_space<vmem>>, %arg9: memref<1x8x32xf32, #tpu.memory_space<vmem>>, %arg10: memref<1x1x8x32xf32, #tpu.memory_space<vmem>>, %arg11: memref<8x64xf32, #tpu.memory_space<vmem>>) attributes {dimension_semantics = [#tpu.dimension_semantics<parallel>, #tpu.dimension_semantics<parallel>, #tpu.dimension_semantics<parallel>, #tpu.dimension_semantics<parallel>, #tpu.dimension_semantics<arbitrary>], iteration_bounds = array<i64: 2, 1, 2, 1, 1>, scalar_prefetch = 0 : i64, scratch_operands = 1 : i64, tpu.core_type = #tpu.core_type<tc>, window_params = [{transform_indices = @transform_0, window_bounds = array<i64: 1, 8, 32>}, {transform_indices = @transform_1, window_bounds = array<i64: 1, 32, 64>}, {transform_indices = @transform_2, window_bounds = array<i64: 1, 1, 64>}, {transform_indices = @transform_3, window_bounds = array<i64: 1, 8, 32>}, {transform_indices = @transform_4, window_bounds = array<i64: 1, 8, 32>}, {transform_indices = @transform_5, window_bounds = array<i64: 1, 1, 8, 32>}]} {
    %c0_i32 = arith.constant 0 : i32
    %0 = arith.cmpi eq, %arg4, %c0_i32 : i32
    %1 = arith.extui %0 : i1 to i32
    %c0_i32_0 = arith.constant 0 : i32
    %2 = arith.cmpi ne, %1, %c0_i32_0 : i32
    scf.if %2 {
      %cst_12 = arith.constant 0.000000e+00 : f32
      %14 = vector.broadcast %cst_12 : f32 to vector<8x64xf32>
      %c0_13 = arith.constant 0 : index
      %c0_14 = arith.constant 0 : index
      %15 = vector.load %arg11[%c0_13, %c0_14] : memref<8x64xf32, #tpu.memory_space<vmem>>, vector<8x64xf32>
      tpu.vector_store %arg11[%c0_13, %c0_14], %14 {strides = array<i32>} : memref<8x64xf32, #tpu.memory_space<vmem>>, vector<8x64xf32>,
    } else {
    }
    %c0 = arith.constant 0 : index
    %c0_1 = arith.constant 0 : index
    %3 = vector.load %arg11[%c0, %c0_1] : memref<8x64xf32, #tpu.memory_space<vmem>>, vector<8x64xf32>
    %c0_2 = arith.constant 0 : index
    %c0_3 = arith.constant 0 : index
    %c0_4 = arith.constant 0 : index
    %4 = vector.load %arg5[%c0_2, %c0_3, %c0_4] : memref<1x8x32xf32, #tpu.memory_space<vmem>>, vector<1x8x32xf32>
    %5 = vector.shape_cast %4 : vector<1x8x32xf32> to vector<8x32xf32>
    %c0_5 = arith.constant 0 : index
    %c0_6 = arith.constant 0 : index
    %c0_7 = arith.constant 0 : index
    %6 = vector.load %arg6[%c0_5, %c0_6, %c0_7] : memref<1x32x64xf32, #tpu.memory_space<vmem>>, vector<1x32x64xf32>
    %7 = vector.shape_cast %6 : vector<1x32x64xf32> to vector<32x64xf32>
    %cst = arith.constant dense<0.000000e+00> : vector<8x64xf32>
    %8 = tpu.matmul %5, %7, %cst {dimension_numbers = #tpu.dot_dimension_numbers<[1], [0], [0], [1], [0, 0, 1, 1], [], []>} : vector<8x32xf32>, vector<32x64xf32>, vector<8x64xf32> -> vector<8x64xf32>
    %9 = arith.addf %3, %8 : vector<8x64xf32>
    %c0_8 = arith.constant 0 : index
    %c0_9 = arith.constant 0 : index
    %10 = vector.load %arg11[%c0_8, %c0_9] : memref<8x64xf32, #tpu.memory_space<vmem>>, vector<8x64xf32>
    tpu.vector_store %arg11[%c0_8, %c0_9], %9 {strides = array<i32>} : memref<8x64xf32, #tpu.memory_space<vmem>>, vector<8x64xf32>,
    %c0_i32_10 = arith.constant 0 : i32
    %11 = arith.cmpi eq, %arg4, %c0_i32_10 : i32
    %12 = arith.extui %11 : i1 to i32
    %c0_i32_11 = arith.constant 0 : i32
    %13 = arith.cmpi ne, %12, %c0_i32_11 : i32
    scf.if %13 {
      %c0_12 = arith.constant 0 : index
      %c0_13 = arith.constant 0 : index
      %14 = vector.load %arg11[%c0_12, %c0_13] : memref<8x64xf32, #tpu.memory_space<vmem>>, vector<8x64xf32>
      %c0_14 = arith.constant 0 : index
      %c0_15 = arith.constant 0 : index
      %c0_16 = arith.constant 0 : index
      %15 = vector.load %arg7[%c0_14, %c0_15, %c0_16] : memref<1x1x64xf32, #tpu.memory_space<vmem>>, vector<1x1x64xf32>
      %16 = vector.shape_cast %15 : vector<1x1x64xf32> to vector<1x64xf32>
      %17 = vector.broadcast %16 : vector<1x64xf32> to vector<8x64xf32>
      %18 = arith.addf %14, %17 : vector<8x64xf32>
      %19 = vector.extract_strided_slice %18 {offsets = [0, 0], sizes = [8, 32], strides = [1, 1]} : vector<8x64xf32> to vector<8x32xf32>
      %20 = vector.extract_strided_slice %18 {offsets = [0, 32], sizes = [8, 32], strides = [1, 1]} : vector<8x64xf32> to vector<8x32xf32>
      %c0_17 = arith.constant 0 : index
      %c0_18 = arith.constant 0 : index
      %c0_19 = arith.constant 0 : index
      %21 = vector.load %arg8[%c0_17, %c0_18, %c0_19] : memref<1x8x32xf32, #tpu.memory_space<vmem>>, vector<1x8x32xf32>
      %22 = vector.shape_cast %21 : vector<1x8x32xf32> to vector<8x32xf32>
      %23 = arith.mulf %19, %22 : vector<8x32xf32>
      %c0_20 = arith.constant 0 : index
      %c0_21 = arith.constant 0 : index
      %c0_22 = arith.constant 0 : index
      %24 = vector.load %arg9[%c0_20, %c0_21, %c0_22] : memref<1x8x32xf32, #tpu.memory_space<vmem>>, vector<1x8x32xf32>
      %25 = vector.shape_cast %24 : vector<1x8x32xf32> to vector<8x32xf32>
      %26 = arith.mulf %20, %25 : vector<8x32xf32>
      %27 = arith.addf %23, %26 : vector<8x32xf32>
      %c0_23 = arith.constant 0 : index
      %c0_24 = arith.constant 0 : index
      %c0_25 = arith.constant 0 : index
      %c0_26 = arith.constant 0 : index
      %28 = vector.load %arg10[%c0_23, %c0_24, %c0_25, %c0_26] : memref<1x1x8x32xf32, #tpu.memory_space<vmem>>, vector<1x1x8x32xf32>
      %29 = vector.shape_cast %28 : vector<1x1x8x32xf32> to vector<8x32xf32>
      %30 = vector.shape_cast %27 : vector<8x32xf32> to vector<1x1x8x32xf32>
      tpu.vector_store %arg10[%c0_23, %c0_24, %c0_25, %c0_26], %30 {strides = array<i32>} : memref<1x1x8x32xf32, #tpu.memory_space<vmem>>, vector<1x1x8x32xf32>,
    } else {
    }
    return
  }
  func.func @transform_0(%arg0: i32, %arg1: i32, %arg2: i32, %arg3: i32, %arg4: i32) -> (i32, i32, i32) {
    %c0_i32 = arith.constant 0 : i32
    return %arg0, %arg1, %arg4 : i32, i32, i32
  }
  func.func @transform_1(%arg0: i32, %arg1: i32, %arg2: i32, %arg3: i32, %arg4: i32) -> (i32, i32, i32) {
    %c0_i32 = arith.constant 0 : i32
    return %arg2, %arg4, %arg3 : i32, i32, i32
  }
  func.func @transform_2(%arg0: i32, %arg1: i32, %arg2: i32, %arg3: i32, %arg4: i32) -> (i32, i32, i32) {
    %c0_i32 = arith.constant 0 : i32
    %c0_i32_0 = arith.constant 0 : i32
    return %arg2, %c0_i32, %arg3 : i32, i32, i32
  }
  func.func @transform_3(%arg0: i32, %arg1: i32, %arg2: i32, %arg3: i32, %arg4: i32) -> (i32, i32, i32) {
    %c0_i32 = arith.constant 0 : i32
    return %arg2, %arg1, %arg3 : i32, i32, i32
  }
  func.func @transform_4(%arg0: i32, %arg1: i32, %arg2: i32, %arg3: i32, %arg4: i32) -> (i32, i32, i32) {
    %c0_i32 = arith.constant 0 : i32
    return %arg2, %arg1, %arg3 : i32, i32, i32
  }
  func.func @transform_5(%arg0: i32, %arg1: i32, %arg2: i32, %arg3: i32, %arg4: i32) -> (i32, i32, i32, i32) {
    %c0_i32 = arith.constant 0 : i32
    return %arg2, %arg0, %arg1, %arg3 : i32, i32, i32, i32
  }
}

</mosaic_0001>

<bundles_post_ra>
// kernel: tpu_custom_call.1
= control target key start
LH: loop header
LB: loop body
LE: loop exit
PB: predicated region body
PF: predicated region fallthrough
CT: control target
= control target key end

     0   :  { %s1576_s0 = inlined_call_operand.hbm [shape: f32[2,8,32], index: 0, kind: input, shape index: {}]   ;;  %s1577_s1 = inlined_call_operand.hbm [shape: f32[2,32,64], index: 1, kind: input, shape index: {}]   ;;  %s1578_s2 = inlined_call_operand.vmem [shape: f32[2,1,64], index: 2, kind: input, shape index: {}]   ;;  %s1579_s3 = inlined_call_operand.hbm [shape: f32[2,8,32], index: 3, kind: input, shape index: {}]   ;;  %s1580_s4 = inlined_call_operand.hbm [shape: f32[2,8,32], index: 4, kind: input, shape index: {}]   ;;  %s1581_s5 = inlined_call_operand.hbm [shape: f32[2,2,8,32], index: 5, kind: output, shape index: {}]  }
   0x1   :  { %1592 = sst [smem:[#allocation28_spill]] %s1577_s1 }
   0x2   :  { %1593 = sst [smem:[#allocation29_spill]] %s1578_s2 }
   0x3   :  { %1594 = sst [smem:[#allocation30_spill]] %s1581_s5 }
   0x4   :  { %10 = vsyncpa [#allocation4], 0 }
   0x5   :  { %12 = vsyncpa [#allocation4 + $0x1], 0 }
   0x6   :  { %13 = vsyncpa [#allocation7], 0 }
   0x7   :  { %15 = vsyncpa [#allocation7 + $0x1], 0 }
   0x8   :  { %16 = vsyncpa [#allocation10], 0 }
   0x9   :  { %18 = vsyncpa [#allocation10 + $0x1], 0 }
   0xa   :  { %19 = vsyncpa [#allocation5], 0 }
   0xb   :  { %21 = vsyncpa [#allocation5 + $0x1], 0  ;;  %s1253_s18 = smov 0   ;;  %s1255_s19 = smov 0  }
   0xc   :  { %s1257_s20 = smov 0   ;;  %s1259_s21 = smov 0  }
   0xd   :  { %s1261_s22 = smov 0   ;;  %s1263_s23 = smov 0  }
   0xe   :  { %s1265_s24 = smov 0   ;;  %s1267_s25 = smov 0  }
   0xf   :  { %s1269_s26 = smov 0   ;;  %s1271_s27 = smov 0  }
  0x10   :  { %s1273_s28 = smov 0   ;;  %s1275_s29 = smov 0  }
  0x11   :  { %s1277_s30 = smov 0   ;;  %s1279_s6 = smov 0  }
  0x12 LB: > { %1595 = sst [smem:[#allocation16_spill]] %s1158_s18  ;;  %p79_p0 = scmp.eq.s32.totalorder %s1210_s6, 0  ;;  %s1210_s6 = sphi %s1279_s6, %s27_s6   ;;  %s1206_s30 = sphi %s1277_s30, %s1635_s30   ;;  %s1202_s29 = sphi %s1275_s29, %s1645_s29   ;;  %s1198_s28 = sphi %s1273_s28, %s1644_s28   ;;  %s1194_s27 = sphi %s1271_s27, %s1643_s27   ;;  %s1190_s26 = sphi %s1269_s26, %s1632_s26   ;;  %s1186_s25 = sphi %s1267_s25, %s1642_s25   ;;  %s1182_s24 = sphi %s1265_s24, %s1641_s24   ;;  %s1178_s23 = sphi %s1263_s23, %s1630_s23   ;;  %s1174_s22 = sphi %s1261_s22, %s1640_s22   ;;  %s1170_s21 = sphi %s1259_s21, %s1639_s21   ;;  %s1166_s20 = sphi %s1257_s20, %s1628_s20   ;;  %s1162_s19 = sphi %s1255_s19, %s1638_s19   ;;  %s1158_s18 = sphi %s1253_s18, %s1637_s18  }
  0x13   : > { %1596 = sst [smem:[#allocation17_spill]] %s1166_s20  ;;  %p108_p1 = scmp.ne.s32.totalorder %s1178_s23, %s1174_s22 }
  0x14   : > { %1597 = sst [smem:[#allocation18_spill]] %s1178_s23  ;;  %p826_p2 = scmp.lt.s32.totalorder %s1210_s6, 4 }
  0x15   : > { %1598 = sst [smem:[#allocation19_spill]] %s1190_s26  ;;  %s278_s8 = sand.u32 1, %s1210_s6  }
  0x16   : > { %1599 = sst [smem:[#allocation20_spill]] %s1194_s27  ;;  %p110_p3 = por %p108_p1, %p79_p0 }
  0x17   : > { %1600 = sst [smem:[#allocation21_spill]] %s1198_s28  ;;  %s1332_s9 = sand.u32 1, %s1178_s23  }
  0x18   : > { %1601 = sst [smem:[#allocation22_spill]] %s1206_s30  ;;  %s782_s10 = sshll.u32 %s1202_s29, 9 }
  0x19   : > { %s762_s11 = sshll.u32 %s1332_s9, 5  ;;  %s1602_s1 = sld [smem:[#allocation28_spill]] }
  0x1a   : > { %p1341_p4 = pnand %p826_p2, %p110_p3  ;;  %s282_s16 = scalar_lea.vmem [#allocation6], %s762_s11 }
  0x1b   : > { %s292_s17 = sshll.u32 %s282_s16, 4  ;;  %p769_p5 = scmp.ge.s32.totalorder %s1210_s6, 1  ;;  %s293_s17 = int_to_ptr.vmem [resolvable:$true] %s292_s17 }
  0x1c   : > { %s1346_s7 = scalar_lea.sflag [#allocation7], %s278_s8  ;;  %p1585_p6 = pneg %p1341_p4 }
  0x1d   : > { %s959_s5 = scalar_lea.vmem %s293_s17, 512 }
  0x1e   : > { %p960_p7 = scmp.ne.s32.totalorder %s293_s17, %s959_s5 }
  0x1f   : > { %s291_s14 = scalar_lea.hbm %s1602_s1, %s782_s10  ;;  %s1212_s10 = smov [#allocation6]  }
  0x20   : > { %p962_p8 = pnand %p960_p7, %p1585_p6  ;;  %s964_s12 = sshll.u32 %s1212_s10, 4  ;;  %s965_s12 = int_to_ptr.vmem [resolvable:$false] %s964_s12 }
  0x21   : > { %s966_s13 = scalar_lea.vmem %s965_s12, 1024  ;;  %p967_p10 = scmp.lt.s32.totalorder %s293_s17, %s965_s12 }
  0x22   : > { %p963_p9 = pneg %p962_p8  ;;  %p968_p11 = scmp.lt.s32.totalorder %s966_s13, %s959_s5 }
  0x24   : > { %p969_p12 = por %p968_p11, %p967_p10 }
  0x26   : > { %p970_p13 = pnand %p969_p12, %p963_p9 }
  0x28   : > { %973 = shalt.err (!%p970_p13)
}
  0x29   : > { %s1213_s11 = smov 128   ;;  %s1214_s5 = smov 8  }
  0x2a   : > { %815 = dma.hbm_to_vmem [thread:$0]  (!%p1341_p4), %s291_s14, 512, %s293_s17, %s1346_s7, %s1213_s11, %s1213_s11, %s1214_s5  }
  0x2b   : > { %p349_p1 = scmp.lt.s32.totalorder %s1210_s6, 5  ;;  %s1364_s16 = sadd.s32 4294967295, %s1210_s6  }
  0x2c   : > { %s52_s12 = sadd.s32 1, %s1202_s29  ;;  %s60_s13 = sadd.s32 1, %s1206_s30 }
  0x2d   : > { %p1359_p3 = pnand %p769_p5, %p349_p1  ;;  %p54_p7 = scmp.ge.s32.totalorder %s52_s12, 2 }
  0x2e   : > { %s71_s14 = sadd.s32 1, %s1190_s26  ;;  %p78_p8 = scmp.ne.s32.totalorder %s1190_s26, %s1186_s25 }
  0x2f   : > { %p84_p9 = scmp.ne.s32.totalorder %s1186_s25, %s1182_s24  ;;  %s1647_s12 = smov (%p54_p7, %s52_s12), 0 }
  0x30   : > { %1605 = sst [smem:[#allocation23_spill]] %s1647_s12  ;;  %s1649_s13 = smov (!%p54_p7, %s60_s13), %s1206_s30 }
  0x31   : > { %p1379_p5 = por %p79_p0, %p78_p8  ;;  %p85_p10 = scmp.eq.s32.totalorder %s1364_s16, 0 }
  0x32   : > { %p62_p11 = scmp.ge.s32.totalorder %s1649_s13, 2  ;;  %s94_s11 = ssub.s32 %s1202_s29, %s1647_s12 }
  0x33   : > { %p1386_p12 = por %p85_p10, %p84_p9  ;;  %p99_p13 = scmp.eq.s32.totalorder %s94_s11, 0 }
  0x34   : > { %s1651_s13 = smov (%p62_p11, %s1649_s13), 0  ;;  %s1609_s5 = sadd.s32 1, %s1178_s23 }
  0x35   : > { %1608 = sst [smem:[#allocation24_spill]] %s1651_s13  ;;  %s64_s1 = ssub.s32 %s1206_s30, %s1651_s13 }
  0x36   : > { %s1395_s10 = scalar_select %p99_p13, %s1178_s23, %s1609_s5  }
  0x37   : > { %p114_p0 = scmp.ne.s32.totalorder %s1174_s22, %s1170_s21  ;;  %p69_p1 = scmp.eq.s32.totalorder %s64_s1, 0 }
  0x38   : > { %1610 = sst [smem:[#allocation25_spill]] %s1395_s10  ;;  %s214_s12 = sor.u32 %s94_s11, %s64_s1 }
  0x39   : > { %p1401_p7 = por %p114_p0, %p85_p10  ;;  %p219_p8 = scmp.eq.s32.totalorder %s214_s12, 0 }
  0x3a   : > { %s1406_s28 = scalar_select %p69_p1, %s1190_s26, %s71_s14  }
  0x3b   : > { %s221_s27 = sadd.s32 1, %s1166_s20  ;;  %p231_p9 = scmp.ne.s32.totalorder %s1166_s20, %s1162_s19 }
  0x3c   : > { %1612 = sst [smem:[#allocation26_spill]] %s1406_s28  ;;  %p232_p11 = scmp.eq.s32.totalorder %s1364_s16, 3 }
  0x3d   : > { %s1412_s5 = scalar_select %p219_p8, %s1166_s20, %s221_s27  }
  0x3e   : > { %p237_p13 = scmp.ne.s32.totalorder %s1162_s19, %s1158_s18  ;;  %s1614_s21 = sadd.s32 4294967294, %s1210_s6  }
  0x3f   : > { %1613 = sst [smem:[#allocation27_spill]] %s1412_s5  ;;  %p238_p6 = scmp.eq.s32.totalorder %s1614_s21, 3 }
  0x40   : > { %s258_s1 = sand.u32 1, %s1190_s26   ;;  %p1420_p10 = por %p232_p11, %p231_p9 }
  0x41   : > { %p1424_p0 = por %p238_p6, %p237_p13  ;;  %s760_s14 = sshll.u32 %s258_s1, 3 }
  0x42   : > { %s761_s13 = sshll.u32 %s1206_s30, 7  ;;  %s262_s23 = scalar_lea.vmem [#allocation3], %s760_s14 }
  0x43   : > { %s1616_s12 = scalar_select %p1424_p0, 1, 0 }
  0x44   : > { %s269_s27 = scalar_lea.hbm %s1576_s0, %s761_s13  ;;  %s271_s5 = sshll.u32 %s262_s23, 4  ;;  %s272_s5 = int_to_ptr.vmem [resolvable:$true] %s271_s5 }
  0x45   : > { %p1436_p1 = pnand %p826_p2, %p1379_p5  ;;  %s765_s26 = sshll.u32 %s1332_s9, 3 }
  0x46   : > { %s766_s20 = sshll.u32 %s1202_s29, 7  ;;  %s259_s18 = scalar_lea.sflag [#allocation4], %s258_s1 }
  0x47   : > { %p976_p6 = pneg %p1436_p1  ;;  %s987_s30 = scalar_lea.vmem %s272_s5, 128 }
  0x48   : > { %p988_p8 = scmp.ne.s32.totalorder %s272_s5, %s987_s30  ;;  %s1215_s28 = smov [#allocation3]  }
  0x49   : > { %s992_s10 = sshll.u32 %s1215_s28, 4  ;;  %s993_s10 = int_to_ptr.vmem [resolvable:$false] %s992_s10 }
  0x4a   : > { %p990_p9 = pnand %p988_p8, %p976_p6  ;;  %s994_s23 = scalar_lea.vmem %s993_s10, 256 }
  0x4b   : > { %p995_p13 = scmp.lt.s32.totalorder %s272_s5, %s993_s10  ;;  %p996_p0 = scmp.lt.s32.totalorder %s994_s23, %s987_s30 }
  0x4c   : > { %p991_p11 = pneg %p990_p9 }
  0x4d   : > { %p997_p2 = por %p996_p0, %p995_p13 }
  0x4f   : > { %p998_p5 = pnand %p997_p2, %p991_p11 }
  0x51   : > { %1001 = shalt.err (!%p998_p5)
}
  0x52   : > { %812 = dma.hbm_to_vmem [thread:$0]  (!%p1436_p1), %s269_s27, 128, %s272_s5, %s259_s18  }
  0x53   : > { %s322_s1 = scalar_lea.hbm %s1579_s3, %s766_s20  ;;  %s315_s14 = scalar_lea.vmem [#allocation8], %s765_s26 }
  0x54   : > { %s324_s28 = sshll.u32 %s315_s14, 4  ;;  %p1618_p0 = pneg %p1341_p4  ;;  %s325_s28 = int_to_ptr.vmem [resolvable:$true] %s324_s28 }
  0x55   : > { %s1015_s10 = scalar_lea.vmem %s325_s28, 128  ;;  %s1216_s30 = smov [#allocation8]  }
  0x56   : > { %p1016_p6 = scmp.ne.s32.totalorder %s325_s28, %s1015_s10  ;;  %s1020_s21 = sshll.u32 %s1216_s30, 4  ;;  %s1021_s21 = int_to_ptr.vmem [resolvable:$false] %s1020_s21 }
  0x57   : > { %s1022_s23 = scalar_lea.vmem %s1021_s21, 256  ;;  %p1023_p1 = scmp.lt.s32.totalorder %s325_s28, %s1021_s21 }
  0x58   : > { %p1018_p8 = pnand %p1016_p6, %p1618_p0  ;;  %p1024_p11 = scmp.lt.s32.totalorder %s1022_s23, %s1015_s10 }
  0x5a   : > { %p1019_p9 = pneg %p1018_p8  ;;  %p1025_p13 = por %p1024_p11, %p1023_p1 }
  0x5c   : > { %p1026_p2 = pnand %p1025_p13, %p1019_p9 }
  0x5e   : > { %1029 = shalt.err (!%p1026_p2)
}
  0x5f   : > { %818 = dma.hbm_to_vmem [thread:$0]  (!%p1341_p4), %s322_s1, 128, %s325_s28, %s1346_s7  }
  0x60   : > { %s342_s27 = scalar_lea.hbm %s1580_s4, %s766_s20  ;;  %s335_s13 = scalar_lea.vmem [#allocation9], %s765_s26 }
  0x61   : > { %s344_s17 = sshll.u32 %s335_s13, 4  ;;  %s332_s14 = scalar_lea.sflag [#allocation10], %s1332_s9  ;;  %s345_s17 = int_to_ptr.vmem [resolvable:$true] %s344_s17 }
  0x62   : > { %s1043_s10 = scalar_lea.vmem %s345_s17, 128  ;;  %p1619_p6 = pmov %p1618_p0 }
  0x63   : > { %p1044_p5 = scmp.ne.s32.totalorder %s345_s17, %s1043_s10  ;;  %s1217_s30 = smov [#allocation9]  }
  0x64   : > { %s1048_s21 = sshll.u32 %s1217_s30, 4  ;;  %s1049_s21 = int_to_ptr.vmem [resolvable:$false] %s1048_s21 }
  0x65   : > { %p1046_p0 = pnand %p1044_p5, %p1619_p6  ;;  %s1050_s7 = scalar_lea.vmem %s1049_s21, 256 }
  0x66   : > { %p1051_p9 = scmp.lt.s32.totalorder %s345_s17, %s1049_s21  ;;  %p1052_p1 = scmp.lt.s32.totalorder %s1050_s7, %s1043_s10 }
  0x67   : > { %p1047_p8 = pneg %p1046_p0 }
  0x68   : > { %p1053_p11 = por %p1052_p1, %p1051_p9 }
  0x6a   : > { %p1054_p13 = pnand %p1053_p11, %p1047_p8 }
  0x6c   : > { %1057 = shalt.err (!%p1054_p13)
}
  0x6d   : > { %821 = dma.hbm_to_vmem [thread:$0]  (!%p1341_p4), %s342_s27, 128, %s345_s17, %s332_s14  }
  0x6e   : > { %353 = sbr.rel (%p1359_p3) target bundleno = 469 (0x1d5), region = 40  ;;  %s355_s20 = sand.u32 (!%p1359_p3), 1, %s1186_s25  }
  0x6f   : > { %s1475_s26 = sshll.u32 (!%p1359_p3), %s355_s20, 3  ;;  %s356_s9 = scalar_lea.sflag (!%p1359_p3), [#allocation4], %s355_s20 }
  0x70   : > { %s359_s1 = scalar_lea.vmem (!%p1359_p3), [#allocation3], %s1475_s26 }
  0x73   : > { %1141 = dma.done.wait (%p1386_p12), %s356_s9, 128  }
  0x74   : > { %1143 = vsyncadd (%p1386_p12), %s356_s9, 4294967168  ;;  %s364_s15 = sand.u32 1, %s1364_s16   ;;  %s366_s28 = sand.u32 1, %s1174_s22  }
  0x75   : > { %s771_s8 = sshll.u32 %s366_s28, 5  ;;  %s365_s23 = scalar_lea.sflag [#allocation7], %s364_s15 }
  0x76   : > { %s368_s18 = scalar_lea.vmem [#allocation6], %s771_s8 }
  0x77   : > { %1145 = dma.done.wait (%p1401_p7), %s365_s23, 640  }
  0x78   : > { %1147 = vsyncadd (%p1401_p7), %s365_s23, 4294966656  ;;  %s772_s5 = sshll.u32 %s366_s28, 3  ;;  %s383_s13 = scalar_lea.sflag [#allocation10], %s366_s28 }
  0x79   : > { %s1488_s27 = scalar_lea.vmem [#allocation8], %s772_s5  ;;  %s386_s24 = scalar_lea.vmem [#allocation9], %s772_s5 }
  0x7a   : > { %1149 = dma.done.wait (%p1401_p7), %s383_s13, 128  }
  0x7b   : > { %1151 = vsyncadd (%p1401_p7), %s383_s13, 4294967168  ;;  %vm445_vm0 = vcmask 523264   ;;  %v1218_v0 = vmov 0.0   ;;  %vm1219_vm1 = vmmov 0   ;;  %v452_v1 = vld [vmem:[%s368_s18 + $0x18] sm:$0xff]  ;;  %v451_v2 = vld [vmem:[%s368_s18 + $0x10] sm:$0xff] }
  0x7c   : > { %788 = vmatprep.subr.mxu0 %v1218_v0  ;;  %796 = vmatprep.mubr.msk.f32.mxu0 %vm1219_vm1, %v1218_v0  ;;  %446 = vst.msk [vmem:[#allocation2] sm:$0xff] %vm445_vm0, %v1218_v0  ;;  %s1620_s16 = sld [smem:[#allocation20_spill]]  ;;  %v544_v3 = vld [vmem:[%s386_s24] sm:$0xff]  ;;  %v450_v4 = vld [vmem:[%s368_s18 + $0x8] sm:$0xff]  ;;  %s1220_s17 = smov 32   ;;  %v449_v5 = vld [vmem:[%s368_s18] sm:$0xff] }
  0x7d   : > { %789 = vmatpush3.msra.mxu0 %v452_v1  ;;  %546 = vrot.lane.b32.xlu0 %v544_v3, %s1220_s17  ;;  %v448_v6 = vld [vmem:[%s359_s1] sm:$0xff]  ;;  %vm453_vm2 = vcmask 261120   ;;  %s1621_s2 = sld [smem:[#allocation21_spill]]  ;;  %s1221_s20 = smov 96   ;;  %v542_v16 = vld [vmem:[%s1488_s27] sm:$0xff] }
  0x7e   : > { %790 = vmatprep.subr.mxu0 %v1218_v0  ;;  %s1622_s21 = sld [smem:[#allocation29_spill]]  ;;  %s431_s26 = sand.u32 1, %s1162_s19  }
  0x7f   : > { %791 = vmatpush3.msra.mxu0 %v451_v2  ;;  %s774_s9 = sshll.u32 %s431_s26, 3  ;;  %s1623_s13 = sld [smem:[#allocation30_spill]] }
  0x80   : > { %792 = vmatprep.subr.mxu0 %v1218_v0  ;;  %s433_s8 = scalar_lea.vmem [#allocation11], %s774_s9  ;;  %s557_s17 = scalar_lea.sflag [#allocation5], %s431_s26 }
  0x81   : > { %793 = vmatpush3.msra.mxu0 %v450_v4  ;;  %s574_s23 = sshll.u32 %s433_s8, 4  ;;  %s1222_s27 = smov [#allocation11]   ;;  %s575_s23 = int_to_ptr.vmem [resolvable:$true] %s574_s23 }
  0x82   : > { %794 = vmatprep.subr.mxu0 %v1218_v0  ;;  %p435_p4 = scmp.lt.s32.totalorder %s1620_s16, 1  ;;  %s778_s1 = sshll.u32 %s1620_s16, 1 }
  0x83   : > { %795 = vmatpush3.msra.mxu0 %v449_v5  ;;  %v447_v7 = vld [vmem:[#allocation2] sm:$0xff]  ;;  %s570_s15 = sadd.s32 %s1621_s2, %s778_s1 }
  0x84   : > { %797 = vmatmul.mubr.msk.f32.vlgmr.msra.gmra.mxu0 %vm453_vm2, %v448_v6  ;;  %s436_s14 = scalar_select %p435_p4, %s1620_s16, 1 }
  0x85   : > { %s779_s28 = sshll.u32 %s570_s15, 7  ;;  %s1062_s16 = sshll.u32 %s1222_s27, 4  ;;  %s1063_s16 = int_to_ptr.vmem [resolvable:$false] %s1062_s16 }
  0x86   : > { %s440_s7 = scalar_lea.vmem %s1622_s21, %s436_s14  ;;  %s572_s24 = scalar_lea.hbm %s1623_s13, %s779_s28 }
  0x87   : > { %v776_v11 = vld [vmem:[%s440_s7] ss:$0 sm:$0xff]  ;;  %s1058_s14 = scalar_lea.vmem %s575_s23, 128  ;;  %s1064_s2 = scalar_lea.vmem %s1063_s16, 256 }
  0x88   : > { %p1059_p3 = scmp.ne.s32.totalorder %s575_s23, %s1058_s14  ;;  %p1065_p2 = scmp.lt.s32.totalorder %s575_s23, %s1063_s16 }
  0x89   : > { %p1066_p5 = scmp.lt.s32.totalorder %s1064_s2, %s1058_s14 }
  0x8a   : > { %p1060_p12 = pnand %p1059_p3, %p1420_p10 }
  0x8b   : > { %p1067_p6 = por %p1066_p5, %p1065_p2 }
  0x8c   : > { %p1061_p7 = pneg %p1060_p12 }
  0x8e   : > { %p1068_p0 = pnand %p1067_p6, %p1061_p7 }
  0xef   : > { %v547_v12 = vpop.permute.xlu0 %546 }
 0x144   : > { %v523_v8 = vpop.f32.mrf.mxu0 }
 0x145   : > { %v527_v9 = vadd.f32 %v523_v8, %v447_v7 }
 0x146   : > { %v798_v10 = vpop.f32.mrf.mxu0 }
 0x147   : > { %529 = vst.msk [vmem:[#allocation2] sm:$0xff] %vm445_vm0, %v527_v9 }
 0x14e   : > { %v533_v13 = vld [vmem:[#allocation2] sm:$0xff] }
 0x14f   : > { %v541_v14 = vadd.f32 %v776_v11, %v533_v13 }
 0x151   : > { %v549_v15 = vmul.f32 %v547_v12, %v541_v14  ;;  %v543_v17 = vmul.f32 %v542_v16, %v541_v14 }
 0x153   : > { %551 = vrot.lane.b32.xlu0 %v549_v15, %s1221_s20 }
 0x1c5   : > { %v552_v18 = vpop.permute.xlu0 %551 }
 0x1c6   : > { %v554_v19 = vadd.f32 %v552_v18, %v543_v17 }
 0x1c8   : > { %555 = vst.msk [vmem:[%s433_s8] sm:$0xff] %vm453_vm2, %v554_v19 }
 0x1c9   : > { %1071 = shalt.err (!%p1068_p0)
}
 0x1ca   : > { %s1072_s10 = scalar_lea.hbm %s572_s24, 128  ;;  %s1076_s7 = scalar_lea.hbm %s1623_s13, 512 }
 0x1cb   : > { %p1073_p8 = scmp.ne.s32.totalorder %s572_s24, %s1072_s10  ;;  %p1077_p11 = scmp.lt.s32.totalorder %s572_s24, %s1623_s13 }
 0x1cc   : > { %p1078_p13 = scmp.lt.s32.totalorder %s1076_s7, %s1072_s10 }
 0x1cd   : > { %p1074_p9 = pnand %p1073_p8, %p1420_p10 }
 0x1ce   : > { %p1079_p4 = por %p1078_p13, %p1077_p11 }
 0x1cf   : > { %p1075_p1 = pneg %p1074_p9 }
 0x1d1   : > { %p1080_p3 = pnand %p1079_p4, %p1075_p1 }
 0x1d3   : > { %1083 = shalt.err (!%p1080_p3)
}
 0x1d4   : > { %807 = dma.vmem_to_hbm [thread:$0]  (%p1420_p10), %s575_s23, 128, %s572_s24, %s557_s17  }
 0x1d5 PF: > { %s1624_s9 = sld [smem:[#allocation16_spill]]  ;;  %p827_p12 = scmp.ge.s32.totalorder %s1210_s6, 2 }
 0x1d6   : > { %p1625_p7 = scmp.ne.s32.totalorder %s1616_s12, 0 }
 0x1d8   : > { %p823_p2 = pnand %p827_p12, %p1625_p7 }
 0x1da   : > { %p824_p5 = pneg %p823_p2 }
 0x1db   : > { %s586_s1 = sand.u32 1, %s1624_s9  }
 0x1dc   : > { %s587_s15 = scalar_lea.sflag [#allocation5], %s586_s1 }
 0x1dd   : > { %1153 = dma.done.wait (%p824_p5), %s587_s15, 128  }
 0x1de   : > { %1155 = vsyncadd (%p824_p5), %s587_s15, 4294967168  ;;  %s27_s6 = sadd.s32 1, %s1210_s6   ;;  %s1627_s11 = sld [smem:[#allocation17_spill]] }
 0x1df   : > { %p1529_p6 = scmp.ge.s32.totalorder %s27_s6, 6   ;;  %s1628_s20 = sld [smem:[#allocation27_spill]] }
 0x1e0   : > { %s1629_s8 = sld [smem:[#allocation18_spill]]  ;;  %s1637_s18 = smov %s1162_s19 }
 0x1e1   : > { %s1630_s23 = sld [smem:[#allocation25_spill]]  ;;  %s1639_s21 = smov %s1174_s22 }
 0x1e2   : > { %s1631_s5 = sld [smem:[#allocation19_spill]]  ;;  %s1641_s24 = smov %s1186_s25 }
 0x1e3   : > { %s1632_s26 = sld [smem:[#allocation26_spill]]  ;;  %s1643_s27 = smov %s1202_s29 }
 0x1e4   : > { %s1633_s12 = sld [smem:[#allocation22_spill]]  ;;  %s1638_s19 = smov %s1627_s11 }
 0x1e5   : > { %s1634_s17 = sld [smem:[#allocation23_spill]] }
 0x1e6   : > { %s1635_s30 = sld [smem:[#allocation24_spill]]  ;;  %s1640_s22 = smov %s1629_s8 }
 0x1e7   :  { %26 = sbr.rel (!%p1529_p6) target bundleno = 18 (0x12), region = 133 }
 0x1e8   : > { %s1642_s25 = smov %s1631_s5 }
 0x1ea   : > { %s1644_s28 = smov %s1633_s12 }
 0x1eb   : > { %s1645_s29 = smov %s1634_s17 }
 0x1ec   :  { %592 = vsyncpa [#allocation4], 1 }
 0x1ed   :  { %594 = vsyncpa [#allocation4 + $0x1], 1 }
 0x1ee   :  { %595 = vsyncpa [#allocation7], 1 }
 0x1ef   :  { %597 = vsyncpa [#allocation7 + $0x1], 1 }
 0x1f0   :  { %598 = vsyncpa [#allocation10], 1 }
 0x1f1   :  { %600 = vsyncpa [#allocation10 + $0x1], 1 }
 0x1f2   :  { %601 = vsyncpa [#allocation5], 1 }
 0x1f3   :  { %603 = vsyncpa [#allocation5 + $0x1], 1 }

</bundles_post_ra>
